<compile_context>
chip_gen: v7x
topology: tpu7x:2x2x1
jax: 0.10.0
libtpu: 0.0.40
codegen_flags: <defaults>
</compile_context>

<pallas_src>
import functools

import jax
import jax.numpy as jnp
from jax.experimental import pallas as pl
from jax.experimental.pallas import tpu as pltpu

EPSILON = 1e-05

_LANE = 128          # output tiles must be lane-dense multiples of this
_SUBLANE = 8         # f32 sublane height: batch tiles are multiples of this
_MAX_TILE_B = 1024   # beyond ~1024 rows/tile, HBM-roofline gains flatten out


def _vmem_budget_bytes():
    """Generation-aware usable-VMEM budget."""
    try:
        cap = pltpu.get_tpu_info().vmem_capacity_bytes
    except Exception:                     # unknown target: assume smallest (v7x-class)
        cap = 64 * 1024 * 1024
    if cap <= 64 * 1024 * 1024:           # v7x: 64 MiB physical
        return 48 * 1024 * 1024
    return 100 * 1024 * 1024              # v5e/v6e: 128 MiB physical


def prepare_nalu_params(w_nac, g_param, w_param, *, vmem_budget=None):
    """One-time weight prep (hoisted out of the forward pass).

    Returns a dict with:
      w_cat : bf16 (I, n_o * 2 * o_tile) per-output-tile interleaved [NAC_j | gate_j]
              columns, so both x-LHS matmuls fuse into one MXU issue per O tile.
      w_t   : f32  (I, n_o * o_tile)     W^T for the multiplicative (log/exp) path.
    """
    I, O = w_nac.shape
    assert g_param.shape == (O, I) and w_param.shape == (O, I)
    if vmem_budget is None:
        vmem_budget = _vmem_budget_bytes()

    O_pad = max(_LANE, pl.cdiv(O, _LANE) * _LANE)

    # Resident weight bytes per output column, conservatively budgeted at 2 buffers
    # (the kernel asks for 1 when grid-invariant; 2x keeps the fallback path safe):
    #   w_cat: 2 cols * I * 2B (bf16)  +  w_t: 1 col * I * 4B (f32)
    per_col_bytes = 2 * (2 * I * 2 + I * 4)
    if per_col_bytes * O_pad <= vmem_budget // 2:
        o_tile = O_pad                                        # all weights VMEM-resident
    else:                                                     # O-tile so large layers fit
        o_tile = max(_LANE, (vmem_budget // 2 // per_col_bytes) // _LANE * _LANE)
    n_o = pl.cdiv(O_pad, o_tile)
    O_pad = n_o * o_tile

    pad_cols = ((0, 0), (0, O_pad - O))
    w_nac_p = jnp.pad(w_nac.astype(jnp.float32), pad_cols)    # pad cols -> nac = 0
    g_t_p = jnp.pad(g_param.T.astype(jnp.float32), pad_cols)  # pad cols -> logit = 0 (g=0.5)
    w_t_p = jnp.pad(w_param.T.astype(jnp.float32), pad_cols)  # pad cols -> m = 1

    # Interleave per O tile: [NAC_0 | gate_0 | NAC_1 | gate_1 | ...] so a BlockSpec of
    # width 2*o_tile always sees its NAC columns in [:o_tile] and gate in [o_tile:].
    w_cat = jnp.concatenate(
        [w_nac_p.reshape(I, n_o, o_tile), g_t_p.reshape(I, n_o, o_tile)],
        axis=2,
    ).reshape(I, 2 * O_pad).astype(jnp.bfloat16)

    return dict(
        w_cat=w_cat, w_t=w_t_p,
        input_size=I, output_size=O,
        o_tile=o_tile, n_o=n_o, o_pad=O_pad,
        vmem_budget=vmem_budget,
    )


def _nalu_kernel(x_ref, w_cat_ref, w_t_ref, out_ref, *, o_tile):
    x = x_ref[...]                                            # (tile_b, I) f32

    # Fused NAC + gate-logit matmul on the MXU (bf16 operands, f32 accumulation).
    fused = jnp.dot(x.astype(jnp.bfloat16), w_cat_ref[...],
                    preferred_element_type=jnp.float32)
    nac = fused[:, :o_tile]
    g = jax.nn.sigmoid(fused[:, o_tile:])

    # Multiplicative path stays f32: the logit is exponentiated, so bf16 error
    # there would be visibly amplified.
    log_in = jnp.log(jnp.abs(x) + EPSILON)
    m = jnp.exp(jnp.dot(log_in, w_t_ref[...], preferred_element_type=jnp.float32))

    # g*nac + (1-g)*m == g*(nac - m) + m   (one fewer VPU multiply per element)
    out_ref[...] = (g * (nac - m) + m).astype(out_ref.dtype)


def nalu_forward(x, params):
    """x: (B, I) f32 -> (B, O) f32."""
    B, I = x.shape
    assert I == params["input_size"]
    O = params["output_size"]
    o_tile, n_o, o_pad = params["o_tile"], params["n_o"], params["o_pad"]
    w_cat, w_t = params["w_cat"], params["w_t"]
    vmem_budget = params["vmem_budget"]

    # --- batch tile sizing from the remaining VMEM budget -----------------------
    weight_resident = 2 * (2 * I * 2 + I * 4) * o_tile        # conservative 2x buffers
    remaining = max(vmem_budget - weight_resident, 2 * 1024 * 1024)
    # Per-row bytes: pipelined x (8*I) + out (8*o_tile) double-buffers plus in-kernel
    # temporaries (fused f32, x bf16, log_in, m, blend).
    per_row = 14 * I + 28 * o_tile
    tile_b_cap = max(_SUBLANE,
                     min(_MAX_TILE_B, remaining // per_row // _SUBLANE * _SUBLANE))

    n_b = pl.cdiv(B, tile_b_cap)
    if n_b == 1 and n_o == 1 and B > _SUBLANE:
        n_b = 2                        # >=2 grid steps so both v7x TensorCores get work
    tile_b = pl.cdiv(pl.cdiv(B, n_b), _SUBLANE) * _SUBLANE    # balanced tiles
    n_b = pl.cdiv(B, tile_b)
    B_pad = n_b * tile_b

    if B_pad != B:
        # Pad rows with ones (not zeros): log(1 + eps) ~ 0 keeps the exp() path finite
        # in pad rows (they are sliced off below anyway).
        x_p = jnp.pad(x, ((0, B_pad - B), (0, 0)), constant_values=1.0)
    else:
        x_p = x

    kernel = functools.partial(_nalu_kernel, o_tile=o_tile)

    cost = pl.CostEstimate(
        flops=2 * B_pad * I * 3 * o_pad,                      # fused + m-path matmuls
        transcendentals=B_pad * (I * n_o + 2 * o_pad),        # log (per O tile) + sigmoid + exp
        bytes_accessed=(4 * B_pad * I * n_o + 2 * I * 2 * o_pad
                        + 4 * I * o_pad + 4 * B_pad * o_pad),
    )

    def build(weight_pipeline_mode):
        grid_spec = pltpu.PrefetchScalarGridSpec(
            num_scalar_prefetch=0,
            grid=(n_o, n_b),                                  # batch innermost: weights only
                                                              # change at O-tile boundaries
            in_specs=[
                pl.BlockSpec((tile_b, I), lambda j, i: (i, 0)),               # x (streamed)
                pl.BlockSpec((I, 2 * o_tile), lambda j, i: (0, j),
                             pipeline_mode=weight_pipeline_mode),             # fused weights
                pl.BlockSpec((I, o_tile), lambda j, i: (0, j),
                             pipeline_mode=weight_pipeline_mode),             # W^T (f32)
            ],
            out_specs=pl.BlockSpec((tile_b, o_tile), lambda j, i: (i, j)),
        )
        return pl.pallas_call(
            kernel,
            out_shape=jax.ShapeDtypeStruct((B_pad, o_pad), x.dtype),
            grid_spec=grid_spec,
            compiler_params=pltpu.CompilerParams(
                dimension_semantics=("parallel", "parallel"),
                vmem_limit_bytes=vmem_budget,
            ),
            cost_estimate=cost,
        )

    # Grid-invariant weights (n_o == 1) only need a single VMEM buffer; fall back to
    # the default double-buffered pipeline if this jax build rejects Buffered(1).
    weight_mode = pl.Buffered(1) if n_o == 1 else None
    try:
        out_padded = jax.block_until_ready(build(weight_mode)(x_p, w_cat, w_t))
    except Exception:
        if weight_mode is None:
            raise
        out_padded = build(None)(x_p, w_cat, w_t)

    if (B_pad, o_pad) != (B, O):
        return out_padded[:B, :O]
    return out_padded


def nalu_reference(x, w_nac, g_param, w_param):
    nac = x @ w_nac
    g = jax.nn.sigmoid(x @ g_param.T)
    m = jnp.exp(jnp.log(jnp.abs(x) + EPSILON) @ w_param.T)
    return g * nac + (1.0 - g) * m


if __name__ == "__main__":
    key = jax.random.PRNGKey(0)
    k_x, k_g, k_w, k_what, k_mhat = jax.random.split(key, 5)

    batch, input_size, output_size = 8, 32, 16

    x = jax.random.normal(k_x, (batch, input_size), dtype=jnp.float32)

    # NALU parameters: G, W of shape (output_size, input_size)
    g_param = jax.random.normal(k_g, (output_size, input_size), dtype=jnp.float32) * 0.5
    w_param = jax.random.normal(k_w, (output_size, input_size), dtype=jnp.float32) * 0.5

    # NAC(output_size, input_size) -> W_hat / M_hat of shape (input_size, output_size);
    # W = tanh(W_hat) * sigmoid(M_hat), used as x @ W -> (batch, output_size).
    w_hat = jax.random.normal(k_what, (input_size, output_size), dtype=jnp.float32) * 0.5
    m_hat = jax.random.normal(k_mhat, (input_size, output_size), dtype=jnp.float32) * 0.5
    w_nac = jnp.tanh(w_hat) * jax.nn.sigmoid(m_hat)

    params = prepare_nalu_params(w_nac, g_param, w_param)     # one-time weight prep
    out = nalu_forward(x, params)
    out = jax.block_until_ready(out)

    ref = nalu_reference(x, w_nac, g_param, w_param)
    assert out.shape == (batch, output_size)
    # NAC/gate matmul runs on the bf16 MXU path (f32 accumulation); compare against
    # the f32 reference with bf16-appropriate tolerances.
    assert jnp.allclose(out, ref, atol=5e-2, rtol=5e-2), "Pallas NALU mismatch vs JAX reference"

    print("KERNEL_OK")
</pallas_src>

<mosaic_0001>
module attributes {stable_mosaic.version = 11 : i64} {
  func.func @_nalu_kernel(%arg0: i32, %arg1: i32, %arg2: memref<8x32xf32, #tpu.memory_space<vmem>>, %arg3: memref<32x256xbf16, #tpu.memory_space<vmem>>, %arg4: memref<32x128xf32, #tpu.memory_space<vmem>>, %arg5: memref<8x128xf32, #tpu.memory_space<vmem>>) attributes {dimension_semantics = [#tpu.dimension_semantics<parallel>, #tpu.dimension_semantics<parallel>], iteration_bounds = array<i64: 1, 1>, scalar_prefetch = 0 : i64, scratch_operands = 0 : i64, tpu.core_type = #tpu.core_type<tc>, window_params = [{transform_indices = @transform_0, window_bounds = array<i64: 8, 32>}, {pipeline_mode = #tpu.pipeline_mode<synchronous>, transform_indices = @transform_1, window_bounds = array<i64: 32, 256>}, {pipeline_mode = #tpu.pipeline_mode<synchronous>, transform_indices = @transform_2, window_bounds = array<i64: 32, 128>}, {transform_indices = @transform_3, window_bounds = array<i64: 8, 128>}]} {
    %c0 = arith.constant 0 : index
    %c0_0 = arith.constant 0 : index
    %0 = vector.load %arg2[%c0, %c0_0] : memref<8x32xf32, #tpu.memory_space<vmem>>, vector<8x32xf32>
    %1 = arith.truncf %0 : vector<8x32xf32> to vector<8x32xbf16>
    %c0_1 = arith.constant 0 : index
    %c0_2 = arith.constant 0 : index
    %2 = vector.load %arg3[%c0_1, %c0_2] : memref<32x256xbf16, #tpu.memory_space<vmem>>, vector<32x256xbf16>
    %cst = arith.constant dense<0.000000e+00> : vector<8x256xf32>
    %3 = tpu.matmul %1, %2, %cst {dimension_numbers = #tpu.dot_dimension_numbers<[1], [0], [0], [1], [0, 0, 1, 1], [], []>} : vector<8x32xbf16>, vector<32x256xbf16>, vector<8x256xf32> -> vector<8x256xf32>
    %4 = vector.extract_strided_slice %3 {offsets = [0, 0], sizes = [8, 128], strides = [1, 1]} : vector<8x256xf32> to vector<8x128xf32>
    %5 = vector.extract_strided_slice %3 {offsets = [0, 128], sizes = [8, 128], strides = [1, 1]} : vector<8x256xf32> to vector<8x128xf32>
    %6 = arith.negf %5 : vector<8x128xf32>
    %7 = math.exp %6 : vector<8x128xf32>
    %cst_3 = arith.constant 1.000000e+00 : f32
    %8 = vector.broadcast %cst_3 : f32 to vector<8x128xf32>
    %9 = arith.addf %8, %7 : vector<8x128xf32>
    %10 = arith.divf %8, %9 : vector<8x128xf32>
    %11 = math.absf %0 : vector<8x32xf32>
    %cst_4 = arith.constant 9.99999974E-6 : f32
    %12 = vector.broadcast %cst_4 : f32 to vector<8x32xf32>
    %13 = arith.addf %11, %12 : vector<8x32xf32>
    %14 = math.log %13 : vector<8x32xf32>
    %c0_5 = arith.constant 0 : index
    %c0_6 = arith.constant 0 : index
    %15 = vector.load %arg4[%c0_5, %c0_6] : memref<32x128xf32, #tpu.memory_space<vmem>>, vector<32x128xf32>
    %cst_7 = arith.constant dense<0.000000e+00> : vector<8x128xf32>
    %16 = tpu.matmul %14, %15, %cst_7 {dimension_numbers = #tpu.dot_dimension_numbers<[1], [0], [0], [1], [0, 0, 1, 1], [], []>} : vector<8x32xf32>, vector<32x128xf32>, vector<8x128xf32> -> vector<8x128xf32>
    %17 = math.exp %16 : vector<8x128xf32>
    %18 = arith.subf %4, %17 : vector<8x128xf32>
    %19 = arith.mulf %10, %18 : vector<8x128xf32>
    %20 = arith.addf %19, %17 : vector<8x128xf32>
    %c0_8 = arith.constant 0 : index
    %c0_9 = arith.constant 0 : index
    %21 = vector.load %arg5[%c0_8, %c0_9] : memref<8x128xf32, #tpu.memory_space<vmem>>, vector<8x128xf32>
    tpu.vector_store %arg5[%c0_8, %c0_9], %20 {strides = array<i32>} : memref<8x128xf32, #tpu.memory_space<vmem>>, vector<8x128xf32>,
    return
  }
  func.func @transform_0(%arg0: i32, %arg1: i32) -> (i32, i32) {
    %c0_i32 = arith.constant 0 : i32
    %c0_i32_0 = arith.constant 0 : i32
    return %arg1, %c0_i32 : i32, i32
  }
  func.func @transform_1(%arg0: i32, %arg1: i32) -> (i32, i32) {
    %c0_i32 = arith.constant 0 : i32
    %c0_i32_0 = arith.constant 0 : i32
    return %c0_i32, %arg0 : i32, i32
  }
  func.func @transform_2(%arg0: i32, %arg1: i32) -> (i32, i32) {
    %c0_i32 = arith.constant 0 : i32
    %c0_i32_0 = arith.constant 0 : i32
    return %c0_i32, %arg0 : i32, i32
  }
  func.func @transform_3(%arg0: i32, %arg1: i32) -> (i32, i32) {
    %c0_i32 = arith.constant 0 : i32
    return %arg1, %arg0 : i32, i32
  }
}

module attributes {stable_mosaic.version = 11 : i64} {
  func.func @_nalu_kernel(%arg0: i32, %arg1: i32, %arg2: memref<8x32xf32, #tpu.memory_space<vmem>>, %arg3: memref<32x256xbf16, #tpu.memory_space<vmem>>, %arg4: memref<32x128xf32, #tpu.memory_space<vmem>>, %arg5: memref<8x128xf32, #tpu.memory_space<vmem>>) attributes {dimension_semantics = [#tpu.dimension_semantics<parallel>, #tpu.dimension_semantics<parallel>], iteration_bounds = array<i64: 1, 1>, scalar_prefetch = 0 : i64, scratch_operands = 0 : i64, tpu.core_type = #tpu.core_type<tc>, window_params = [{transform_indices = @transform_0, window_bounds = array<i64: 8, 32>}, {transform_indices = @transform_1, window_bounds = array<i64: 32, 256>}, {transform_indices = @transform_2, window_bounds = array<i64: 32, 128>}, {transform_indices = @transform_3, window_bounds = array<i64: 8, 128>}]} {
    %c0 = arith.constant 0 : index
    %c0_0 = arith.constant 0 : index
    %0 = vector.load %arg2[%c0, %c0_0] : memref<8x32xf32, #tpu.memory_space<vmem>>, vector<8x32xf32>
    %1 = arith.truncf %0 : vector<8x32xf32> to vector<8x32xbf16>
    %c0_1 = arith.constant 0 : index
    %c0_2 = arith.constant 0 : index
    %2 = vector.load %arg3[%c0_1, %c0_2] : memref<32x256xbf16, #tpu.memory_space<vmem>>, vector<32x256xbf16>
    %cst = arith.constant dense<0.000000e+00> : vector<8x256xf32>
    %3 = tpu.matmul %1, %2, %cst {dimension_numbers = #tpu.dot_dimension_numbers<[1], [0], [0], [1], [0, 0, 1, 1], [], []>} : vector<8x32xbf16>, vector<32x256xbf16>, vector<8x256xf32> -> vector<8x256xf32>
    %4 = vector.extract_strided_slice %3 {offsets = [0, 0], sizes = [8, 128], strides = [1, 1]} : vector<8x256xf32> to vector<8x128xf32>
    %5 = vector.extract_strided_slice %3 {offsets = [0, 128], sizes = [8, 128], strides = [1, 1]} : vector<8x256xf32> to vector<8x128xf32>
    %6 = arith.negf %5 : vector<8x128xf32>
    %7 = math.exp %6 : vector<8x128xf32>
    %cst_3 = arith.constant 1.000000e+00 : f32
    %8 = vector.broadcast %cst_3 : f32 to vector<8x128xf32>
    %9 = arith.addf %8, %7 : vector<8x128xf32>
    %10 = arith.divf %8, %9 : vector<8x128xf32>
    %11 = math.absf %0 : vector<8x32xf32>
    %cst_4 = arith.constant 9.99999974E-6 : f32
    %12 = vector.broadcast %cst_4 : f32 to vector<8x32xf32>
    %13 = arith.addf %11, %12 : vector<8x32xf32>
    %14 = math.log %13 : vector<8x32xf32>
    %c0_5 = arith.constant 0 : index
    %c0_6 = arith.constant 0 : index
    %15 = vector.load %arg4[%c0_5, %c0_6] : memref<32x128xf32, #tpu.memory_space<vmem>>, vector<32x128xf32>
    %cst_7 = arith.constant dense<0.000000e+00> : vector<8x128xf32>
    %16 = tpu.matmul %14, %15, %cst_7 {dimension_numbers = #tpu.dot_dimension_numbers<[1], [0], [0], [1], [0, 0, 1, 1], [], []>} : vector<8x32xf32>, vector<32x128xf32>, vector<8x128xf32> -> vector<8x128xf32>
    %17 = math.exp %16 : vector<8x128xf32>
    %18 = arith.subf %4, %17 : vector<8x128xf32>
    %19 = arith.mulf %10, %18 : vector<8x128xf32>
    %20 = arith.addf %19, %17 : vector<8x128xf32>
    %c0_8 = arith.constant 0 : index
    %c0_9 = arith.constant 0 : index
    %21 = vector.load %arg5[%c0_8, %c0_9] : memref<8x128xf32, #tpu.memory_space<vmem>>, vector<8x128xf32>
    tpu.vector_store %arg5[%c0_8, %c0_9], %20 {strides = array<i32>} : memref<8x128xf32, #tpu.memory_space<vmem>>, vector<8x128xf32>,
    return
  }
  func.func @transform_0(%arg0: i32, %arg1: i32) -> (i32, i32) {
    %c0_i32 = arith.constant 0 : i32
    %c0_i32_0 = arith.constant 0 : i32
    return %arg1, %c0_i32 : i32, i32
  }
  func.func @transform_1(%arg0: i32, %arg1: i32) -> (i32, i32) {
    %c0_i32 = arith.constant 0 : i32
    %c0_i32_0 = arith.constant 0 : i32
    return %c0_i32, %arg0 : i32, i32
  }
  func.func @transform_2(%arg0: i32, %arg1: i32) -> (i32, i32) {
    %c0_i32 = arith.constant 0 : i32
    %c0_i32_0 = arith.constant 0 : i32
    return %c0_i32, %arg0 : i32, i32
  }
  func.func @transform_3(%arg0: i32, %arg1: i32) -> (i32, i32) {
    %c0_i32 = arith.constant 0 : i32
    return %arg1, %arg0 : i32, i32
  }
}

</mosaic_0001>

<bundles_post_ra>
// kernel: tpu_custom_call.1
= control target key start
LH: loop header
LB: loop body
LE: loop exit
PB: predicated region body
PF: predicated region fallthrough
CT: control target
= control target key end

     0   :  { %8 = vsyncpa [#allocation3], 0  ;;  %s466_s0 = inlined_call_operand.hbm [shape: f32[8,32], index: 0, kind: input, shape index: {}]   ;;  %s467_s1 = inlined_call_operand.hbm [shape: bf16[32,256], index: 1, kind: input, shape index: {}]   ;;  %s468_s2 = inlined_call_operand.hbm [shape: f32[32,128], index: 2, kind: input, shape index: {}]   ;;  %s469_s3 = inlined_call_operand.hbm [shape: f32[8,128], index: 3, kind: output, shape index: {}]  }
   0x1   :  { %9 = vsyncpa [#allocation6], 0 }
   0x2   :  { %10 = vsyncpa [#allocation4], 0  ;;  %s382_s12 = smov [#allocation5]   ;;  %s288_s16 = scalar_lea.hbm %s467_s1, 512 }
   0x3   :  { %s26_s13 = sshll.u32 %s382_s12, 4  ;;  %p289_p0 = scmp.ne.s32.totalorder %s467_s1, %s288_s16  ;;  %s27_s13 = int_to_ptr.vmem [resolvable:$true] %s26_s13 }
   0x4   :  { %p292_p1 = scmp.lt.u32.totalorder %s288_s16, %s467_s1 }
   0x6   :  { %p294_p2 = pnand %p292_p1, %p289_p0 }
   0x8   :  { %297 = shalt.err (!%p294_p2)
}
   0x9   :  { %s298_s21 = scalar_lea.vmem %s27_s13, 512  ;;  %p303_p4 = scmp.lt.s32.totalorder %s27_s13, %s27_s13 }
   0xa   :  { %p299_p3 = scmp.ne.s32.totalorder %s27_s13, %s298_s21  ;;  %p304_p5 = scmp.lt.s32.totalorder %s298_s21, %s298_s21 }
   0xc   :  { %p305_p6 = por %p304_p5, %p303_p4 }
   0xe   :  { %p306_p7 = pnand %p305_p6, %p299_p3 }
  0x10   :  { %309 = shalt.err (!%p306_p7)
}
  0x11   :  { %s383_s22 = smov 128   ;;  %s384_s23 = smov 8  }
  0x12   :  { %32 = dma.hbm_to_vmem [thread:$0]  %s467_s1, 512, %s27_s13, [#allocation6], %s383_s22, %s383_s22, %s384_s23  }
  0x13   :  { %s385_s26 = smov [#allocation2]   ;;  %s386_s28 = smov [#allocation7]  }
  0x14   :  { %s17_s27 = sshll.u32 %s385_s26, 4  ;;  %s38_s29 = sshll.u32 %s386_s28, 4  ;;  %s18_s27 = int_to_ptr.vmem [resolvable:$true] %s17_s27  ;;  %s39_s29 = int_to_ptr.vmem [resolvable:$true] %s38_s29 }
  0x15   :  { %s310_s5 = scalar_lea.hbm %s466_s0, 128 }
  0x16   :  { %p311_p8 = scmp.ne.s32.totalorder %s466_s0, %s310_s5  ;;  %p314_p9 = scmp.lt.u32.totalorder %s310_s5, %s466_s0 }
  0x18   :  { %p316_p10 = pnand %p314_p9, %p311_p8 }
  0x1a   :  { %319 = shalt.err (!%p316_p10)
}
  0x1b   :  { %s320_s1 = scalar_lea.vmem %s18_s27, 128  ;;  %p325_p12 = scmp.lt.s32.totalorder %s18_s27, %s18_s27 }
  0x1c   :  { %p321_p11 = scmp.ne.s32.totalorder %s18_s27, %s320_s1  ;;  %p326_p13 = scmp.lt.s32.totalorder %s320_s1, %s320_s1 }
  0x1e   :  { %p327_p0 = por %p326_p13, %p325_p12 }
  0x20   :  { %p328_p1 = pnand %p327_p0, %p321_p11 }
  0x22   :  { %331 = shalt.err (!%p328_p1)
}
  0x23   :  { %20 = dma.hbm_to_vmem [thread:$0]  %s466_s0, 128, %s18_s27, [#allocation3]  }
  0x24   :  { %s332_s14 = scalar_lea.hbm %s468_s2, 512 }
  0x25   :  { %p333_p2 = scmp.ne.s32.totalorder %s468_s2, %s332_s14  ;;  %p336_p3 = scmp.lt.u32.totalorder %s332_s14, %s468_s2 }
  0x27   :  { %p338_p4 = pnand %p336_p3, %p333_p2 }
  0x29   :  { %341 = shalt.err (!%p338_p4)
}
  0x2a   :  { %s342_s19 = scalar_lea.vmem %s39_s29, 512  ;;  %p347_p6 = scmp.lt.s32.totalorder %s39_s29, %s39_s29 }
  0x2b   :  { %p343_p5 = scmp.ne.s32.totalorder %s39_s29, %s342_s19  ;;  %p348_p7 = scmp.lt.s32.totalorder %s342_s19, %s342_s19 }
  0x2d   :  { %p349_p8 = por %p348_p7, %p347_p6 }
  0x2f   :  { %p350_p9 = pnand %p349_p8, %p343_p5 }
  0x31   :  { %353 = shalt.err (!%p350_p9)
}
  0x32   :  { %44 = dma.hbm_to_vmem [thread:$0]  %s468_s2, 512, %s39_s29, [#allocation6], %s383_s22, %s383_s22, %s384_s23  }
  0x33   :  { %376 = dma.done.wait [#allocation3], 128  }
  0x34   :  { %377 = vsyncadd [#allocation3], 4294967168 }
  0x35   :  { %378 = dma.done.wait [#allocation6], 1024  }
  0x36   :  { %379 = vsyncadd [#allocation6], 4294966272  ;;  %v387_v0 = vmov 0   ;;  %v388_v1 = vmov 0.0|0.0   ;;  %vm389_vm0 = vmmov 0   ;;  %v390_v2 = vmov 0.0  }
  0x37   :  { %117 = vmatprep.mubr.bf16.mxu0 %v387_v0  ;;  %258 = vmatprep.subr.bf16.mxu1 %v388_v1  ;;  %v274_v3 = vld [vmem:[#allocation5 + $0x4] ss:$8 sps:$4 sm:$0xff]   ;;  %v276_v4 = vld [vmem:[#allocation5] ss:$8 sps:$4 sm:$0xff]   ;;  %v277_v5 = vld [vmem:[#allocation5 + $0x14] ss:$8 sps:$4 sm:$0xff]  }
  0x38   :  { %255 = vmatprep.mubr.msk.f32.mxu1 %vm389_vm0, %v390_v2  ;;  %85 = vmatprep.subr.bf16.mxu0 %v274_v3  ;;  %v279_v6 = vld [vmem:[#allocation5 + $0x10] ss:$8 sps:$4 sm:$0xff]   ;;  %v136_v9 = vld [vmem:[#allocation7] sm:$0xff]  ;;  %v137_v10 = vld [vmem:[#allocation7 + $0x8] sm:$0xff]  ;;  %vm81_vm1 = vcmask 261120   ;;  %s391_s2 = smov [#allocation8]  }
  0x39   :  { %v55_v7 = vld [vmem:[#allocation2] sm:$0xff]  ;;  %86 = vmatpush1.bf16.msra.mxu0 %v276_v4  ;;  %v138_v11 = vld [vmem:[#allocation7 + $0x10] sm:$0xff]  ;;  %v259_v12 = vpack.c.bf16 %v137_v10, %v136_v9  ;;  %s225_s21 = sshll.u32 %s391_s2, 4  ;;  %s226_s21 = int_to_ptr.vmem [resolvable:$true] %s225_s21 }
  0x3a   :  { %v132_v8 = vand.u32 2147483647, %v55_v7  ;;  %87 = vmatprep.subr.bf16.mxu0 %v277_v5  ;;  %v139_v13 = vld [vmem:[#allocation7 + $0x18] sm:$0xff]  ;;  %v56_v15 = vpack.c.bf16 %v55_v7, %v55_v7  ;;  %s354_s22 = scalar_lea.vmem %s226_s21, 128  ;;  %p359_p11 = scmp.lt.s32.totalorder %s226_s21, %s226_s21 }
  0x3b   :  { %260 = vmatpush3.bf16.msra.mxu1 %v259_v12  ;;  %v262_v16 = vpack.c.bf16 %v139_v13, %v138_v11  ;;  %p355_p10 = scmp.ne.s32.totalorder %s226_s21, %s354_s22  ;;  %p360_p12 = scmp.lt.s32.totalorder %s354_s22, %s354_s22 }
  0x3c   :  { %v133_v14 = vadd.f32 1e-05, %v132_v8  ;;  %261 = vmatprep.subr.bf16.mxu1 %v388_v1 }
  0x3d   :  { %88 = vmatpush1.bf16.msra.mxu0 %v279_v6  ;;  %p361_p13 = por %p360_p12, %p359_p11 }
  0x3e   :  { %280 = vlog2.f32 %v133_v14 }
  0x3f   :  { %263 = vmatpush3.bf16.msra.mxu1 %v262_v16  ;;  %p362_p0 = pnand %p361_p13, %p355_p10 }
  0x40   :  { %239 = vmatmul.mubr.msk.bf16.vlgmr.msra.gmra.mrb[0].mxu0 %vm81_vm1, %v56_v15 }
  0x48   :  { %v281_v17 = vpop.eup %280 }
  0x49   :  { %v135_v18 = vmul.f32 0.6931472, %v281_v17 }
  0x4b   :  { %256 = vmatmul.mubr.msk.f32.vlgmr.msra.gmra.mrb[0].mxu1 %vm81_vm1, %v135_v18 }
 0x113   :  { %v119_v19 = vpop.f32.mrb[0].mxu0 }
 0x114   :  { %v121_v20 = vpop.f32.mrb[1].mxu0 }
 0x115   :  { %v240_v21 = vmul.f32 -1.442695, %v121_v20  ;;  %v123_v22 = vpop.f32.mrb[2].mxu0 }
 0x116   :  { %v124_v23 = vpop.f32.mrb[3].mxu0 }
 0x117   :  { %282 = vpow2.f32 %v240_v21 }
 0x11e   :  { %v209_v24 = vpop.f32.mrb[0].mxu1 }
 0x11f   :  { %v213_v25 = vmul.f32 1.442695, %v209_v24  ;;  %v257_v26 = vpop.f32.mrb[1].mxu1 }
 0x121   :  { %284 = vpow2.f32 %v213_v25  ;;  %v283_v27 = vpop.eup %282 }
 0x122   :  { %v129_v28 = vadd.f32 1.0, %v283_v27 }
 0x124   :  { %286 = vrcp.f32 %v129_v28 }
 0x12b   :  { %v285_v29 = vpop.eup %284 }
 0x12c   :  { %v215_v30 = vsub.f32 %v119_v19, %v285_v29 }
 0x12e   :  { %v287_v31 = vpop.eup %286 }
 0x12f   :  { %v216_v32 = vmul.f32 %v287_v31, %v215_v30 }
 0x131   :  { %v217_v33 = vadd.f32 %v285_v29, %v216_v32 }
 0x133   :  { %218 = vst [vmem:[#allocation8] sm:$0xff] %v217_v33 }
 0x134   :  { %365 = shalt.err (!%p362_p0)
}
 0x135   :  { %s366_s25 = scalar_lea.hbm %s469_s3, 128 }
 0x136   :  { %p367_p1 = scmp.ne.s32.totalorder %s469_s3, %s366_s25  ;;  %p370_p2 = scmp.lt.u32.totalorder %s366_s25, %s469_s3 }
 0x138   :  { %p372_p3 = pnand %p370_p2, %p367_p1 }
 0x13a   :  { %375 = shalt.err (!%p372_p3)
}
 0x13b   :  { %228 = dma.vmem_to_hbm [thread:$0]  %s226_s21, 128, %s469_s3, [#allocation4]  }
 0x13c   :  { %380 = dma.done.wait [#allocation4], 128  }
 0x13d   :  { %381 = vsyncadd [#allocation4], 4294967168 }
 0x13e   :  { %232 = vsyncpa [#allocation3], 1 }
 0x13f   :  { %233 = vsyncpa [#allocation6], 1 }
 0x140   :  { %234 = vsyncpa [#allocation4], 1 }

// kernel: tpu_custom_call.1
= control target key start
LH: loop header
LB: loop body
LE: loop exit
PB: predicated region body
PF: predicated region fallthrough
CT: control target
= control target key end

     0   :  { %8 = vsyncpa [#allocation3], 0  ;;  %s466_s0 = inlined_call_operand.hbm [shape: f32[8,32], index: 0, kind: input, shape index: {}]   ;;  %s467_s1 = inlined_call_operand.hbm [shape: bf16[32,256], index: 1, kind: input, shape index: {}]   ;;  %s468_s2 = inlined_call_operand.hbm [shape: f32[32,128], index: 2, kind: input, shape index: {}]   ;;  %s469_s3 = inlined_call_operand.hbm [shape: f32[8,128], index: 3, kind: output, shape index: {}]  }
   0x1   :  { %9 = vsyncpa [#allocation6], 0 }
   0x2   :  { %10 = vsyncpa [#allocation4], 0  ;;  %s382_s12 = smov [#allocation5]   ;;  %s288_s16 = scalar_lea.hbm %s467_s1, 512 }
   0x3   :  { %s26_s13 = sshll.u32 %s382_s12, 4  ;;  %p289_p0 = scmp.ne.s32.totalorder %s467_s1, %s288_s16  ;;  %s27_s13 = int_to_ptr.vmem [resolvable:$true] %s26_s13 }
   0x4   :  { %p292_p1 = scmp.lt.u32.totalorder %s288_s16, %s467_s1 }
   0x6   :  { %p294_p2 = pnand %p292_p1, %p289_p0 }
   0x8   :  { %297 = shalt.err (!%p294_p2)
}
   0x9   :  { %s298_s21 = scalar_lea.vmem %s27_s13, 512  ;;  %p303_p4 = scmp.lt.s32.totalorder %s27_s13, %s27_s13 }
   0xa   :  { %p299_p3 = scmp.ne.s32.totalorder %s27_s13, %s298_s21  ;;  %p304_p5 = scmp.lt.s32.totalorder %s298_s21, %s298_s21 }
   0xc   :  { %p305_p6 = por %p304_p5, %p303_p4 }
   0xe   :  { %p306_p7 = pnand %p305_p6, %p299_p3 }
  0x10   :  { %309 = shalt.err (!%p306_p7)
}
  0x11   :  { %s383_s22 = smov 128   ;;  %s384_s23 = smov 8  }
  0x12   :  { %32 = dma.hbm_to_vmem [thread:$0]  %s467_s1, 512, %s27_s13, [#allocation6], %s383_s22, %s383_s22, %s384_s23  }
  0x13   :  { %s385_s26 = smov [#allocation2]   ;;  %s386_s28 = smov [#allocation7]  }
  0x14   :  { %s17_s27 = sshll.u32 %s385_s26, 4  ;;  %s38_s29 = sshll.u32 %s386_s28, 4  ;;  %s18_s27 = int_to_ptr.vmem [resolvable:$true] %s17_s27  ;;  %s39_s29 = int_to_ptr.vmem [resolvable:$true] %s38_s29 }
  0x15   :  { %s310_s5 = scalar_lea.hbm %s466_s0, 128 }
  0x16   :  { %p311_p8 = scmp.ne.s32.totalorder %s466_s0, %s310_s5  ;;  %p314_p9 = scmp.lt.u32.totalorder %s310_s5, %s466_s0 }
  0x18   :  { %p316_p10 = pnand %p314_p9, %p311_p8 }
  0x1a   :  { %319 = shalt.err (!%p316_p10)
}
  0x1b   :  { %s320_s1 = scalar_lea.vmem %s18_s27, 128  ;;  %p325_p12 = scmp.lt.s32.totalorder %s18_s27, %s18_s27 }
  0x1c   :  { %p321_p11 = scmp.ne.s32.totalorder %s18_s27, %s320_s1  ;;  %p326_p13 = scmp.lt.s32.totalorder %s320_s1, %s320_s1 }
  0x1e   :  { %p327_p0 = por %p326_p13, %p325_p12 }
  0x20   :  { %p328_p1 = pnand %p327_p0, %p321_p11 }
  0x22   :  { %331 = shalt.err (!%p328_p1)
}
  0x23   :  { %20 = dma.hbm_to_vmem [thread:$0]  %s466_s0, 128, %s18_s27, [#allocation3]  }
  0x24   :  { %s332_s14 = scalar_lea.hbm %s468_s2, 512 }
  0x25   :  { %p333_p2 = scmp.ne.s32.totalorder %s468_s2, %s332_s14  ;;  %p336_p3 = scmp.lt.u32.totalorder %s332_s14, %s468_s2 }
  0x27   :  { %p338_p4 = pnand %p336_p3, %p333_p2 }
  0x29   :  { %341 = shalt.err (!%p338_p4)
}
  0x2a   :  { %s342_s19 = scalar_lea.vmem %s39_s29, 512  ;;  %p347_p6 = scmp.lt.s32.totalorder %s39_s29, %s39_s29 }
  0x2b   :  { %p343_p5 = scmp.ne.s32.totalorder %s39_s29, %s342_s19  ;;  %p348_p7 = scmp.lt.s32.totalorder %s342_s19, %s342_s19 }
  0x2d   :  { %p349_p8 = por %p348_p7, %p347_p6 }
  0x2f   :  { %p350_p9 = pnand %p349_p8, %p343_p5 }
  0x31   :  { %353 = shalt.err (!%p350_p9)
}
  0x32   :  { %44 = dma.hbm_to_vmem [thread:$0]  %s468_s2, 512, %s39_s29, [#allocation6], %s383_s22, %s383_s22, %s384_s23  }
  0x33   :  { %376 = dma.done.wait [#allocation3], 128  }
  0x34   :  { %377 = vsyncadd [#allocation3], 4294967168 }
  0x35   :  { %378 = dma.done.wait [#allocation6], 1024  }
  0x36   :  { %379 = vsyncadd [#allocation6], 4294966272  ;;  %v387_v0 = vmov 0   ;;  %v388_v1 = vmov 0.0|0.0   ;;  %vm389_vm0 = vmmov 0   ;;  %v390_v2 = vmov 0.0  }
  0x37   :  { %117 = vmatprep.mubr.bf16.mxu0 %v387_v0  ;;  %258 = vmatprep.subr.bf16.mxu1 %v388_v1  ;;  %v274_v3 = vld [vmem:[#allocation5 + $0x4] ss:$8 sps:$4 sm:$0xff]   ;;  %v276_v4 = vld [vmem:[#allocation5] ss:$8 sps:$4 sm:$0xff]   ;;  %v277_v5 = vld [vmem:[#allocation5 + $0x14] ss:$8 sps:$4 sm:$0xff]  }
  0x38   :  { %255 = vmatprep.mubr.msk.f32.mxu1 %vm389_vm0, %v390_v2  ;;  %85 = vmatprep.subr.bf16.mxu0 %v274_v3  ;;  %v279_v6 = vld [vmem:[#allocation5 + $0x10] ss:$8 sps:$4 sm:$0xff]   ;;  %v136_v9 = vld [vmem:[#allocation7] sm:$0xff]  ;;  %v137_v10 = vld [vmem:[#allocation7 + $0x8] sm:$0xff]  ;;  %vm81_vm1 = vcmask 261120   ;;  %s391_s2 = smov [#allocation8]  }
  0x39   :  { %v55_v7 = vld [vmem:[#allocation2] sm:$0xff]  ;;  %86 = vmatpush1.bf16.msra.mxu0 %v276_v4  ;;  %v138_v11 = vld [vmem:[#allocation7 + $0x10] sm:$0xff]  ;;  %v259_v12 = vpack.c.bf16 %v137_v10, %v136_v9  ;;  %s225_s21 = sshll.u32 %s391_s2, 4  ;;  %s226_s21 = int_to_ptr.vmem [resolvable:$true] %s225_s21 }
  0x3a   :  { %v132_v8 = vand.u32 2147483647, %v55_v7  ;;  %87 = vmatprep.subr.bf16.mxu0 %v277_v5  ;;  %v139_v13 = vld [vmem:[#allocation7 + $0x18] sm:$0xff]  ;;  %v56_v15 = vpack.c.bf16 %v55_v7, %v55_v7  ;;  %s354_s22 = scalar_lea.vmem %s226_s21, 128  ;;  %p359_p11 = scmp.lt.s32.totalorder %s226_s21, %s226_s21 }
  0x3b   :  { %260 = vmatpush3.bf16.msra.mxu1 %v259_v12  ;;  %v262_v16 = vpack.c.bf16 %v139_v13, %v138_v11  ;;  %p355_p10 = scmp.ne.s32.totalorder %s226_s21, %s354_s22  ;;  %p360_p12 = scmp.lt.s32.totalorder %s354_s22, %s354_s22 }
  0x3c   :  { %v133_v14 = vadd.f32 1e-05, %v132_v8  ;;  %261 = vmatprep.subr.bf16.mxu1 %v388_v1 }
  0x3d   :  { %88 = vmatpush1.bf16.msra.mxu0 %v279_v6  ;;  %p361_p13 = por %p360_p12, %p359_p11 }
  0x3e   :  { %280 = vlog2.f32 %v133_v14 }
  0x3f   :  { %263 = vmatpush3.bf16.msra.mxu1 %v262_v16  ;;  %p362_p0 = pnand %p361_p13, %p355_p10 }
  0x40   :  { %239 = vmatmul.mubr.msk.bf16.vlgmr.msra.gmra.mrb[0].mxu0 %vm81_vm1, %v56_v15 }
  0x48   :  { %v281_v17 = vpop.eup %280 }
  0x49   :  { %v135_v18 = vmul.f32 0.6931472, %v281_v17 }
  0x4b   :  { %256 = vmatmul.mubr.msk.f32.vlgmr.msra.gmra.mrb[0].mxu1 %vm81_vm1, %v135_v18 }
 0x113   :  { %v119_v19 = vpop.f32.mrb[0].mxu0 }
 0x114   :  { %v121_v20 = vpop.f32.mrb[1].mxu0 }
 0x115   :  { %v240_v21 = vmul.f32 -1.442695, %v121_v20  ;;  %v123_v22 = vpop.f32.mrb[2].mxu0 }
 0x116   :  { %v124_v23 = vpop.f32.mrb[3].mxu0 }
 0x117   :  { %282 = vpow2.f32 %v240_v21 }
 0x11e   :  { %v209_v24 = vpop.f32.mrb[0].mxu1 }
 0x11f   :  { %v213_v25 = vmul.f32 1.442695, %v209_v24  ;;  %v257_v26 = vpop.f32.mrb[1].mxu1 }
 0x121   :  { %284 = vpow2.f32 %v213_v25  ;;  %v283_v27 = vpop.eup %282 }
 0x122   :  { %v129_v28 = vadd.f32 1.0, %v283_v27 }
 0x124   :  { %286 = vrcp.f32 %v129_v28 }
 0x12b   :  { %v285_v29 = vpop.eup %284 }
 0x12c   :  { %v215_v30 = vsub.f32 %v119_v19, %v285_v29 }
 0x12e   :  { %v287_v31 = vpop.eup %286 }
 0x12f   :  { %v216_v32 = vmul.f32 %v287_v31, %v215_v30 }
 0x131   :  { %v217_v33 = vadd.f32 %v285_v29, %v216_v32 }
 0x133   :  { %218 = vst [vmem:[#allocation8] sm:$0xff] %v217_v33 }
 0x134   :  { %365 = shalt.err (!%p362_p0)
}
 0x135   :  { %s366_s25 = scalar_lea.hbm %s469_s3, 128 }
 0x136   :  { %p367_p1 = scmp.ne.s32.totalorder %s469_s3, %s366_s25  ;;  %p370_p2 = scmp.lt.u32.totalorder %s366_s25, %s469_s3 }
 0x138   :  { %p372_p3 = pnand %p370_p2, %p367_p1 }
 0x13a   :  { %375 = shalt.err (!%p372_p3)
}
 0x13b   :  { %228 = dma.vmem_to_hbm [thread:$0]  %s226_s21, 128, %s469_s3, [#allocation4]  }
 0x13c   :  { %380 = dma.done.wait [#allocation4], 128  }
 0x13d   :  { %381 = vsyncadd [#allocation4], 4294967168 }
 0x13e   :  { %232 = vsyncpa [#allocation3], 1 }
 0x13f   :  { %233 = vsyncpa [#allocation6], 1 }
 0x140   :  { %234 = vsyncpa [#allocation4], 1 }

</bundles_post_ra>
